<compile_context>
chip_gen: v7x
topology: tpu7x:2x2x1
jax: 0.10.0
libtpu: 0.0.40
codegen_flags: <defaults>
</compile_context>

<pallas_src>
import functools

import jax
import jax.numpy as jnp
from jax.experimental import pallas as pl
from jax.experimental.pallas import tpu as pltpu


def _round_up(x, m):
    return ((x + m - 1) // m) * m


def _rogcn_kernel(adj_ref, relw_ref, scale_ref, bias_ref, out_ref):
    # adj:(TE,Rp) int8, relw:(Rp,TN) bf16, scale:(TE,1) f32, bias:(1,TN) f32,
    # out:(TE,TN) bf16.
    # int8 -> f32 -> bf16 (explicit two-step convert; cheap VPU work hidden
    # under the MXU matmul).
    adj = adj_ref[...].astype(jnp.float32).astype(jnp.bfloat16)
    y = jnp.dot(adj, relw_ref[...], preferred_element_type=jnp.float32)
    out_ref[...] = (y * scale_ref[...] + bias_ref[...]).astype(out_ref.dtype)


def rogcn_layer_forward(num_entities, source, target, edge_type,
                        rel_emb, weight=None, bias=None, *,
                        tile_entities=1024):
    """JAX wrapper matching RoGCNLayer.forward.

    source/target/edge_type: int32 (num_triples,)  (target is unused, as in ref)
    rel_emb: (num_relations, input_dim) f32
    weight : (input_dim, output_dim) f32 or None  (weighted=False)
    bias   : (output_dim,) f32 or None            (use_bias=False)
    returns: (num_entities, output_dim) f32
    """
    del target  # unused by the reference forward
    num_relations, input_dim = rel_emb.shape
    output_dim = weight.shape[1] if weight is not None else input_dim

    # Fold W into the relation embedding once (f32 matmul in the wrapper).
    rel_w = rel_emb if weight is None else rel_emb @ weight      # (R, Dout) f32

    # --- Tile / padding selection -------------------------------------------
    r_pad = _round_up(num_relations, 128)
    dout_pad = _round_up(output_dim, 128)

    vmem_budget = 48 * 1024 * 1024   # conservative: fits v7x's 64 MiB physical VMEM

    # Output-feature tile: keep the (double-buffered) rel_w block under ~half
    # the budget; tn == dout_pad in the common case so rel_w stays resident.
    tn = dout_pad
    while tn > 128 and 2 * r_pad * tn * 2 > vmem_budget // 2:
        tn = _round_up(tn // 2, 128)
    n_j = -(-dout_pad // tn)
    dout_pad = n_j * tn

    # Entity tile: multiple of 32 (int8 sublane packing), capped so the
    # "parallel" entity axis has >= 2 steps (v7x has 2 TensorCores), then
    # shrunk until the pipelined block footprint fits the VMEM budget.
    te = max(32, _round_up(int(tile_entities), 32))
    te = min(te, max(32, _round_up((num_entities + 1) // 2, 32)))

    def _footprint(te_, tn_):
        return (2 * te_ * r_pad           # adj int8 tiles  (2 pipeline buffers)
                + 2 * r_pad * tn_ * 2     # rel_w bf16 blocks
                + 2 * te_ * 4             # scale f32 tiles (kept tiled: O(TE) VMEM)
                + 2 * tn_ * 4             # bias f32 blocks
                + 2 * te_ * tn_ * 2)      # out bf16 tiles

    while _footprint(te, tn) > vmem_budget and te > 32:
        te = max(32, _round_up(te // 2, 32))

    e_pad = _round_up(num_entities, te)
    n_i = e_pad // te
    vmem_limit = int(min(max(_footprint(te, tn) + (8 << 20), 32 << 20), 56 << 20))

    # --- Build padded operands (adj scattered directly into the padded buffer).
    # TODO(synk): int8 staging is exact only for per-(entity,relation)
    # multiplicities up to 127; use bf16/f32 staging for denser multigraphs.
    adj_p = jnp.zeros((e_pad, r_pad), jnp.int32)
    adj_p = adj_p.at[source, edge_type].add(1).astype(jnp.int8)
    deg_p = jnp.zeros((e_pad,), jnp.float32).at[source].add(1.0)
    scale_p = (1.0 / (deg_p + 1.0)).reshape(e_pad, 1)

    relw_p = jnp.zeros((r_pad, dout_pad), jnp.bfloat16)
    relw_p = relw_p.at[:num_relations, :output_dim].set(rel_w.astype(jnp.bfloat16))

    bias_vec = bias if bias is not None else jnp.zeros((output_dim,), jnp.float32)
    bias_p = jnp.zeros((1, dout_pad), jnp.float32)
    bias_p = bias_p.at[0, :output_dim].set(bias_vec.astype(jnp.float32))

    out_p = pl.pallas_call(
        _rogcn_kernel,
        out_shape=jax.ShapeDtypeStruct((e_pad, dout_pad), jnp.bfloat16),
        grid_spec=pltpu.PrefetchScalarGridSpec(
            num_scalar_prefetch=0,
            grid=(n_i, n_j),
            in_specs=[
                pl.BlockSpec((te, r_pad), lambda i, j: (i, 0)),   # adj (int8)
                pl.BlockSpec((r_pad, tn), lambda i, j: (0, j)),   # rel @ W (bf16)
                pl.BlockSpec((te, 1), lambda i, j: (i, 0)),       # 1/(deg+1)
                pl.BlockSpec((1, tn), lambda i, j: (0, j)),       # bias
            ],
            out_specs=pl.BlockSpec((te, tn), lambda i, j: (i, j)),
        ),
        compiler_params=pltpu.CompilerParams(
            dimension_semantics=("parallel", "parallel"),
            vmem_limit_bytes=vmem_limit,
        ),
    )(adj_p, relw_p, scale_p, bias_p)

    # Module callers expect f32; the kernel stores bf16 (halved writeback) and
    # the slice + upcast here fuses into one XLA copy.
    return out_p[:num_entities, :output_dim].astype(jnp.float32)


def _reference_f32(num_entities, source, edge_type, rel_emb, weight, bias):
    adj = jnp.zeros((num_entities, rel_emb.shape[0]), jnp.float32)
    adj = adj.at[source, edge_type].add(1.0)
    deg = adj.sum(axis=1)
    y = adj @ rel_emb
    y = (1.0 / (deg + 1.0))[:, None] * y
    if weight is not None:
        y = y @ weight
    if bias is not None:
        y = y + bias
    return y


def _reference_kernel_path(num_entities, source, edge_type, rel_emb, weight, bias):
    # Mirrors the kernel numerics: W folded into rel_emb (f32), bf16 matmul
    # inputs, f32 accumulation, scale applied after the matmul, bf16 store.
    adj = jnp.zeros((num_entities, rel_emb.shape[0]), jnp.float32)
    adj = adj.at[source, edge_type].add(1.0)
    deg = adj.sum(axis=1)
    rel_w = rel_emb if weight is None else rel_emb @ weight
    h = jnp.dot(adj.astype(jnp.bfloat16), rel_w.astype(jnp.bfloat16),
                preferred_element_type=jnp.float32)
    y = h * (1.0 / (deg + 1.0))[:, None]
    if bias is not None:
        y = y + bias
    return y.astype(jnp.bfloat16).astype(jnp.float32)


if __name__ == "__main__":
    # Small, deterministic problem (multiple entity tiles to exercise the grid).
    num_entities = 300
    num_relations = 24
    input_dim = 48
    output_dim = 80
    num_triples = 1500

    key = jax.random.PRNGKey(0)
    k_rel, k_w, k_src, k_tgt, k_et = jax.random.split(key, 5)

    # Parameter init (deterministic): Embedding ~ N(0,1), W xavier-normal, bias=0.
    rel_emb = jax.random.normal(k_rel, (num_relations, input_dim), jnp.float32)
    xavier_std = (2.0 / (input_dim + output_dim)) ** 0.5
    weight = xavier_std * jax.random.normal(k_w, (input_dim, output_dim),
                                            jnp.float32)
    bias = jnp.zeros((output_dim,), jnp.float32)

    source = jax.random.randint(k_src, (num_triples,), 0, num_entities,
                                jnp.int32)
    target = jax.random.randint(k_tgt, (num_triples,), 0, num_entities,
                                jnp.int32)
    edge_type = jax.random.randint(k_et, (num_triples,), 0, num_relations,
                                   jnp.int32)

    fwd = jax.jit(functools.partial(rogcn_layer_forward, num_entities))

    # Weighted + bias path.
    y = jax.block_until_ready(fwd(source, target, edge_type, rel_emb, weight,
                                  bias))
    assert y.shape == (num_entities, output_dim)
    assert y.dtype == jnp.float32

    y_ref_k = _reference_kernel_path(num_entities, source, edge_type, rel_emb,
                                     weight, bias)
    y_ref_f = _reference_f32(num_entities, source, edge_type, rel_emb, weight,
                             bias)
    assert jnp.allclose(y, y_ref_k, atol=2e-2, rtol=2e-2), \
        "mismatch vs kernel-path (bf16) reference"
    assert float(jnp.max(jnp.abs(y - y_ref_f))) < 1e-1, \
        "mismatch vs f32 reference"

    # Unweighted / no-bias branch (weighted=False, use_bias=False).
    y2 = jax.block_until_ready(fwd(source, target, edge_type, rel_emb, None,
                                   None))
    y2_ref = _reference_kernel_path(num_entities, source, edge_type, rel_emb,
                                    None, None)
    assert y2.shape == (num_entities, input_dim)
    assert jnp.allclose(y2, y2_ref, atol=2e-2, rtol=2e-2), \
        "mismatch (unweighted path)"

    # TODO(synk): self-loop dropout / activation resolver are identity/no-op in
    # the reference forward (dropout never touches the graph term), so they are
    # intentionally omitted.
    print("KERNEL_OK")
</pallas_src>

<mosaic_0001>
module attributes {stable_mosaic.version = 11 : i64} {
  func.func @_rogcn_kernel(%arg0: i32, %arg1: i32, %arg2: memref<160x128xi8, #tpu.memory_space<vmem>>, %arg3: memref<128x128xbf16, #tpu.memory_space<vmem>>, %arg4: memref<160x1xf32, #tpu.memory_space<vmem>>, %arg5: memref<1x128xf32, #tpu.memory_space<vmem>>, %arg6: memref<160x128xbf16, #tpu.memory_space<vmem>>) attributes {dimension_semantics = [#tpu.dimension_semantics<parallel>, #tpu.dimension_semantics<parallel>], iteration_bounds = array<i64: 2, 1>, scalar_prefetch = 0 : i64, scratch_operands = 0 : i64, tpu.core_type = #tpu.core_type<tc>, window_params = [{transform_indices = @transform_0, window_bounds = array<i64: 160, 128>}, {transform_indices = @transform_1, window_bounds = array<i64: 128, 128>}, {transform_indices = @transform_2, window_bounds = array<i64: 160, 1>}, {transform_indices = @transform_3, window_bounds = array<i64: 1, 128>}, {transform_indices = @transform_4, window_bounds = array<i64: 160, 128>}]} {
    %c0 = arith.constant 0 : index
    %c0_0 = arith.constant 0 : index
    %0 = vector.load %arg2[%c0, %c0_0] : memref<160x128xi8, #tpu.memory_space<vmem>>, vector<160x128xi8>
    %1 = arith.sitofp %0 : vector<160x128xi8> to vector<160x128xf32>
    %2 = arith.truncf %1 : vector<160x128xf32> to vector<160x128xbf16>
    %c0_1 = arith.constant 0 : index
    %c0_2 = arith.constant 0 : index
    %3 = vector.load %arg3[%c0_1, %c0_2] : memref<128x128xbf16, #tpu.memory_space<vmem>>, vector<128x128xbf16>
    %cst = arith.constant dense<0.000000e+00> : vector<160x128xf32>
    %4 = tpu.matmul %2, %3, %cst {dimension_numbers = #tpu.dot_dimension_numbers<[1], [0], [0], [1], [0, 0, 1, 1], [], []>} : vector<160x128xbf16>, vector<128x128xbf16>, vector<160x128xf32> -> vector<160x128xf32>
    %c0_3 = arith.constant 0 : index
    %c0_4 = arith.constant 0 : index
    %5 = vector.load %arg4[%c0_3, %c0_4] : memref<160x1xf32, #tpu.memory_space<vmem>>, vector<160x1xf32>
    %6 = vector.broadcast %5 : vector<160x1xf32> to vector<160x128xf32>
    %7 = arith.mulf %4, %6 : vector<160x128xf32>
    %c0_5 = arith.constant 0 : index
    %c0_6 = arith.constant 0 : index
    %8 = vector.load %arg5[%c0_5, %c0_6] : memref<1x128xf32, #tpu.memory_space<vmem>>, vector<1x128xf32>
    %9 = vector.broadcast %8 : vector<1x128xf32> to vector<160x128xf32>
    %10 = arith.addf %7, %9 : vector<160x128xf32>
    %11 = arith.truncf %10 : vector<160x128xf32> to vector<160x128xbf16>
    %c0_7 = arith.constant 0 : index
    %c0_8 = arith.constant 0 : index
    %12 = vector.load %arg6[%c0_7, %c0_8] : memref<160x128xbf16, #tpu.memory_space<vmem>>, vector<160x128xbf16>
    tpu.vector_store %arg6[%c0_7, %c0_8], %11 {strides = array<i32>} : memref<160x128xbf16, #tpu.memory_space<vmem>>, vector<160x128xbf16>,
    return
  }
  func.func @transform_0(%arg0: i32, %arg1: i32) -> (i32, i32) {
    %c0_i32 = arith.constant 0 : i32
    %c0_i32_0 = arith.constant 0 : i32
    return %arg0, %c0_i32 : i32, i32
  }
  func.func @transform_1(%arg0: i32, %arg1: i32) -> (i32, i32) {
    %c0_i32 = arith.constant 0 : i32
    %c0_i32_0 = arith.constant 0 : i32
    return %c0_i32, %arg1 : i32, i32
  }
  func.func @transform_2(%arg0: i32, %arg1: i32) -> (i32, i32) {
    %c0_i32 = arith.constant 0 : i32
    %c0_i32_0 = arith.constant 0 : i32
    return %arg0, %c0_i32 : i32, i32
  }
  func.func @transform_3(%arg0: i32, %arg1: i32) -> (i32, i32) {
    %c0_i32 = arith.constant 0 : i32
    %c0_i32_0 = arith.constant 0 : i32
    return %c0_i32, %arg1 : i32, i32
  }
  func.func @transform_4(%arg0: i32, %arg1: i32) -> (i32, i32) {
    %c0_i32 = arith.constant 0 : i32
    return %arg0, %arg1 : i32, i32
  }
}

</mosaic_0001>

<bundles_post_ra>
// kernel: rogcn_layer_forward.1
= control target key start
LH: loop header
LB: loop body
LE: loop exit
PB: predicated region body
PF: predicated region fallthrough
CT: control target
= control target key end

     0   :  { %s1123_s15 = smov 0   ;;  %s1125_s16 = smov 0   ;;  %s1280_s0 = inlined_call_operand.vmem [shape: s8[320,128], index: 0, kind: input, shape index: {}]   ;;  %s1281_s1 = inlined_call_operand.vmem [shape: bf16[128,128], index: 1, kind: input, shape index: {}]   ;;  %s1282_s2 = inlined_call_operand.vmem [shape: f32[320,1], index: 2, kind: input, shape index: {}]   ;;  %s1283_s3 = inlined_call_operand.vmem [shape: f32[1,128], index: 3, kind: input, shape index: {}]   ;;  %s1284_s4 = inlined_call_operand.vmem [shape: bf16[320,128], index: 4, kind: output, shape index: {}]  }
   0x1   :  { %s1127_s17 = smov 0  }
   0x2 LB: > { %s26_s18 = sadd.s32 1, %s1091_s16  ;;  %p854_p0 = scmp.ge.s32.totalorder %s1095_s17, 1  ;;  %s1095_s17 = sphi %s1127_s17, %s14_s17   ;;  %s1091_s16 = sphi %s1125_s16, %s1286_s16   ;;  %s1087_s15 = sphi %s1123_s15, %s1285_s15  }
   0x3   : > { %p28_p1 = scmp.ge.s32.totalorder %s26_s18, 2  ;;  %p205_p2 = scmp.lt.s32.totalorder %s1095_s17, 3 }
   0x5   : > { %s1288_s18 = smov (%p28_p1, %s26_s18), 0  ;;  %p206_p3 = pnand %p854_p0, %p205_p2 }
   0x6   : > { %v1065_v0 = vld [vmem:[%s1281_s1] sm:$0xff] (!%p206_p3)   ;;  %s246_s21 = smul.u32 (!%p206_p3), 5, %s1087_s15  ;;  %v1066_v1 = vld [vmem:[%s1281_s1 + $0x8] sm:$0xff] (!%p206_p3)   ;;  %v1067_v2 = vld [vmem:[%s1281_s1 + $0x10] sm:$0xff] (!%p206_p3)   ;;  %v1097_v3 = vmov (!%p206_p3), 0  }
   0x7   : > { %209 = sbr.rel (%p206_p3) target bundleno = 278 (0x116), region = 36  ;;  %986 = vmatprep.subr.bf16.mxu0 (!%p206_p3), %v1065_v0  ;;  %1022 = vmatprep.subr.bf16.mxu1 (!%p206_p3), %v1065_v0  ;;  %v1068_v4 = vld [vmem:[%s1281_s1 + $0x18] sm:$0xff] (!%p206_p3)   ;;  %v1069_v9 = vld [vmem:[%s1281_s1 + $0x20] sm:$0xff] (!%p206_p3)   ;;  %v1070_v14 = vld [vmem:[%s1281_s1 + $0x28] sm:$0xff] (!%p206_p3)  }
   0x8   : > { %p247_p4 = scmp.lt.s32.totalorder (!%p206_p3), %s246_s21, 9  ;;  %987 = vmatpush3.bf16.msra.mxu0 (!%p206_p3), %v1065_v0  ;;  %1030 = vmatpush3.bf16.msra.mxu1 (!%p206_p3), %v1065_v0  ;;  %s256_s24 = smul.u32 (!%p206_p3), 20, %s1087_s15  ;;  %v1071_v17 = vld [vmem:[%s1281_s1 + $0x30] sm:$0xff] (!%p206_p3)   ;;  %v1072_v20 = vld [vmem:[%s1281_s1 + $0x38] sm:$0xff] (!%p206_p3)  }
   0x9   : > { %988 = vmatprep.subr.bf16.mxu0 (!%p206_p3), %v1066_v1  ;;  %1023 = vmatprep.subr.bf16.mxu1 (!%p206_p3), %v1066_v1 }
   0xa   : > { %1064 = vset.pattern.permute.xlu1 (!%p206_p3), %v1097_v3  ;;  %1063 = vset.pattern.permute.xlu0 (!%p206_p3), %v1097_v3  ;;  %p257_p5 = scmp.lt.s32.totalorder (!%p206_p3), %s256_s24, 39 }
   0xc   : > { %989 = vmatpush3.bf16.msra.mxu0 (!%p206_p3), %v1066_v1  ;;  %1031 = vmatpush3.bf16.msra.mxu1 (!%p206_p3), %v1066_v1 }
   0xd   : > { %990 = vmatprep.subr.bf16.mxu0 (!%p206_p3), %v1067_v2  ;;  %1024 = vmatprep.subr.bf16.mxu1 (!%p206_p3), %v1067_v2 }
   0xe   : > { %s1290_s21 = smov (!%p247_p4, %s246_s21), 9  ;;  %s1292_s24 = smov (!%p257_p5, %s256_s24), 39 }
   0xf   : > { %s855_s27 = sshll.u32 %s1290_s21, 3  ;;  %s856_s7 = sshll.u32 %s1292_s24, 3 }
  0x10   : > { %s1157_s30 = scalar_lea.vmem %s1280_s0, %s855_s27  ;;  %991 = vmatpush3.bf16.msra.mxu0 %v1067_v2  ;;  %1032 = vmatpush3.bf16.msra.mxu1 %v1067_v2  ;;  %s1176_s10 = scalar_lea.vmem %s1282_s2, %s856_s7 }
  0x11   : > { %v1163_v5 = vld [vmem:[%s1157_s30] sm:$0xff]  ;;  %v1166_v6 = vld [vmem:[%s1157_s30 + $0x18] sm:$0xff]  ;;  %992 = vmatprep.subr.bf16.mxu0 %v1068_v4  ;;  %1025 = vmatprep.subr.bf16.mxu1 %v1068_v4  ;;  %v469_v10 = vld [vmem:[%s1176_s10 + $0x10] sm:$0xff]  ;;  %s857_s25 = sshll.u32 %s1292_s24, 2 }
  0x12   : > { %v280_v7 = vunpack.c.l.s8.bf16 %v1163_v5  ;;  %v286_v8 = vunpack.c.l.s8.bf16 %v1166_v6  ;;  %v467_v11 = vld [vmem:[%s1176_s10] sm:$0xff]  ;;  %499 = vperm.xlu1 %1064, %v469_v10   ;;  %v470_v12 = vld [vmem:[%s1176_s10 + $0x18] sm:$0xff]  ;;  %v468_v13 = vld [vmem:[%s1176_s10 + $0x8] sm:$0xff]  ;;  %v281_v25 = vunpack.c.h.s8.bf16 %v1163_v5  ;;  %v287_v26 = vunpack.c.h.s8.bf16 %v1166_v6  ;;  %s1240_s27 = scalar_lea.vmem %s1284_s4, %s857_s25 }
  0x13   : > { %489 = vperm.xlu0 %1063, %v467_v11   ;;  %v472_v15 = vld [vmem:[%s1176_s10 + $0x28] sm:$0xff]  ;;  %v471_v16 = vld [vmem:[%s1176_s10 + $0x20] sm:$0xff]  ;;  %v474_v18 = vld [vmem:[%s1176_s10 + $0x38] sm:$0xff] }
  0x14   : > { %1002 = vmatprep.mubr.bf16.mxu0 %v280_v7  ;;  %1014 = vmatprep.mubr.bf16.mxu1 %v286_v8  ;;  %v473_v19 = vld [vmem:[%s1176_s10 + $0x30] sm:$0xff]  ;;  %v476_v21 = vld [vmem:[%s1176_s10 + $0x48] sm:$0xff]  ;;  %v475_v22 = vld [vmem:[%s1176_s10 + $0x40] sm:$0xff] }
  0x15   : > { %993 = vmatpush3.bf16.msra.mxu0 %v1068_v4  ;;  %1033 = vmatpush3.bf16.msra.mxu1 %v1068_v4  ;;  %v276_v23 = vld [vmem:[%s1157_s30 + $0x8] sm:$0xff]  ;;  %v279_v24 = vld [vmem:[%s1157_s30 + $0x20] sm:$0xff]  ;;  %v478_v29 = vld [vmem:[%s1176_s10 + $0x58] sm:$0xff] }
  0x16   : > { %994 = vmatprep.subr.bf16.mxu0 %v1069_v9  ;;  %1026 = vmatprep.subr.bf16.mxu1 %v1069_v9  ;;  %v282_v27 = vunpack.c.l.s8.bf16 %v276_v23  ;;  %v288_v28 = vunpack.c.l.s8.bf16 %v279_v24  ;;  %v477_v30 = vld [vmem:[%s1176_s10 + $0x50] sm:$0xff]  ;;  %v480_v32 = vld [vmem:[%s1176_s10 + $0x68] sm:$0xff]  ;;  %v479_v33 = vld [vmem:[%s1176_s10 + $0x60] sm:$0xff]  ;;  %v283_v34 = vunpack.c.h.s8.bf16 %v276_v23  ;;  %v289_v35 = vunpack.c.h.s8.bf16 %v279_v24 }
  0x17   : > { %504 = vperm.xlu1 %1064, %v470_v12   ;;  %494 = vperm.xlu0 %1063, %v468_v13   ;;  %v277_v31 = vld [vmem:[%s1157_s30 + $0x10] sm:$0xff]  ;;  %v482_v37 = vld [vmem:[%s1176_s10 + $0x78] sm:$0xff]  ;;  %v484_v39 = vld [vmem:[%s1176_s10 + $0x88] sm:$0xff] }
  0x18   : > { %v284_v36 = vunpack.c.l.s8.bf16 %v277_v31  ;;  %v481_v38 = vld [vmem:[%s1176_s10 + $0x70] sm:$0xff]  ;;  %v483_v40 = vld [vmem:[%s1176_s10 + $0x80] sm:$0xff]  ;;  %v285_v41 = vunpack.c.h.s8.bf16 %v277_v31  ;;  %v486_v42 = vld [vmem:[%s1176_s10 + $0x98] sm:$0xff] }
  0x19   : > { %995 = vmatpush3.bf16.msra.mxu0 %v1069_v9  ;;  %1034 = vmatpush3.bf16.msra.mxu1 %v1069_v9  ;;  %v485_v43 = vld [vmem:[%s1176_s10 + $0x90] sm:$0xff]  ;;  %v1228_v4 = vld [vmem:[%s1283_s3] ss:$0 sm:$0xff] }
  0x1a   : > { %996 = vmatprep.subr.bf16.mxu0 %v1070_v14  ;;  %1027 = vmatprep.subr.bf16.mxu1 %v1070_v14 }
  0x1b   : > { %514 = vperm.xlu1 %1064, %v472_v15   ;;  %509 = vperm.xlu0 %1063, %v471_v16  }
  0x1d   : > { %997 = vmatpush3.bf16.msra.mxu0 %v1070_v14  ;;  %1035 = vmatpush3.bf16.msra.mxu1 %v1070_v14 }
  0x1e   : > { %998 = vmatprep.subr.bf16.mxu0 %v1071_v17  ;;  %1028 = vmatprep.subr.bf16.mxu1 %v1071_v17 }
  0x1f   : > { %524 = vperm.xlu1 %1064, %v474_v18   ;;  %519 = vperm.xlu0 %1063, %v473_v19  }
  0x21   : > { %999 = vmatpush3.bf16.msra.mxu0 %v1071_v17  ;;  %1036 = vmatpush3.bf16.msra.mxu1 %v1071_v17 }
  0x22   : > { %1000 = vmatprep.subr.bf16.mxu0 %v1072_v20  ;;  %1029 = vmatprep.subr.bf16.mxu1 %v1072_v20 }
  0x23   : > { %534 = vperm.xlu1 %1064, %v476_v21   ;;  %529 = vperm.xlu0 %1063, %v475_v22  }
  0x25   : > { %1001 = vmatpush3.bf16.msra.mxu0 %v1072_v20  ;;  %1037 = vmatpush3.bf16.msra.mxu1 %v1072_v20 }
  0x27   : > { %544 = vperm.xlu1 %1064, %v478_v29   ;;  %539 = vperm.xlu0 %1063, %v477_v30  }
  0x28   : > { %1003 = vmatmul.mubr.bf16.vlgmr.msra.gmra.mrb[0].mxu0 %v281_v25  ;;  %1015 = vmatmul.mubr.bf16.vlgmr.msra.gmra.mrb[0].mxu1 %v287_v26 }
  0x29   : > { %1006 = vmatprep.mubr.bf16.mxu0 %v282_v27  ;;  %1018 = vmatprep.mubr.bf16.mxu1 %v288_v28 }
  0x2b   : > { %554 = vperm.xlu1 %1064, %v480_v32   ;;  %549 = vperm.xlu0 %1063, %v479_v33  }
  0x2f   : > { %564 = vperm.xlu1 %1064, %v482_v37   ;;  %559 = vperm.xlu0 %1063, %v481_v38  }
  0x30   : > { %1007 = vmatmul.mubr.bf16.gmra.mrb[4].mxu0 %v283_v34  ;;  %1019 = vmatmul.mubr.bf16.gmra.mrb[4].mxu1 %v289_v35 }
  0x31   : > { %1010 = vmatprep.mubr.bf16.mxu0 %v284_v36 }
  0x33   : > { %574 = vperm.xlu1 %1064, %v484_v39   ;;  %569 = vperm.xlu0 %1063, %v483_v40  }
  0x37   : > { %584 = vperm.xlu1 %1064, %v486_v42   ;;  %579 = vperm.xlu0 %1063, %v485_v43  }
  0x38   : > { %1011 = vmatmul.mubr.bf16.gmra.mrb[8].mxu0 %v285_v41 }
  0x91   : > { %v500_v44 = vpop.permute.xlu1 %499 }
  0x92   : > { %v490_v45 = vpop.permute.xlu0 %489 }
  0x96   : > { %v505_v46 = vpop.permute.xlu1 %504  ;;  %v495_v47 = vpop.permute.xlu0 %494 }
  0x9a   : > { %v1215_v48 = vpop.permute.xlu1 %514  ;;  %v510_v49 = vpop.permute.xlu0 %509 }
  0x9e   : > { %v525_v50 = vpop.permute.xlu1 %524  ;;  %v520_v51 = vpop.permute.xlu0 %519 }
  0xa2   : > { %v1217_v52 = vpop.permute.xlu1 %534  ;;  %v1219_v53 = vpop.permute.xlu0 %529 }
  0xa6   : > { %v1221_v54 = vpop.permute.xlu1 %544  ;;  %v1223_v55 = vpop.permute.xlu0 %539 }
  0xaa   : > { %v555_v56 = vpop.permute.xlu1 %554  ;;  %v550_v57 = vpop.permute.xlu0 %549 }
  0xae   : > { %v565_v58 = vpop.permute.xlu1 %564  ;;  %v560_v59 = vpop.permute.xlu0 %559 }
  0xb2   : > { %v575_v60 = vpop.permute.xlu1 %574  ;;  %v570_v61 = vpop.permute.xlu0 %569 }
  0xb6   : > { %v585_v23 = vpop.permute.xlu1 %584  ;;  %v580_v24 = vpop.permute.xlu0 %579 }
  0xfb   : > { %v1004_v62 = vpop.f32.mrb[0].mxu0  ;;  %v1016_v63 = vpop.f32.mrb[0].mxu1 }
  0xfc   : > { %v589_v0 = vmul.f32 %v1004_v62, %v500_v44  ;;  %v601_v1 = vmul.f32 %v1016_v63, %v560_v59  ;;  %v388_v2 = vpop.f32.mrb[1].mxu0  ;;  %v436_v3 = vpop.f32.mrb[1].mxu1 }
  0xfd   : > { %v587_v5 = vmul.f32 %v490_v45, %v388_v2  ;;  %v599_v6 = vmul.f32 %v550_v57, %v436_v3  ;;  %v1005_v7 = vpop.f32.mrb[2].mxu0  ;;  %v1017_v8 = vpop.f32.mrb[2].mxu1 }
  0xfe   : > { %v590_v9 = vmul.f32 %v1005_v7, %v505_v46  ;;  %v602_v10 = vmul.f32 %v1017_v8, %v565_v58  ;;  %v391_v11 = vpop.f32.mrb[3].mxu0  ;;  %v439_v12 = vpop.f32.mrb[3].mxu1  ;;  %v616_v15 = vadd.f32 %v1228_v4, %v589_v0  ;;  %v628_v16 = vadd.f32 %v1228_v4, %v601_v1 }
  0xff   : > { %v588_v13 = vmul.f32 %v495_v47, %v391_v11  ;;  %v600_v14 = vmul.f32 %v555_v56, %v439_v12  ;;  %v614_v19 = vadd.f32 %v1228_v4, %v587_v5  ;;  %v626_v20 = vadd.f32 %v1228_v4, %v599_v6 }
 0x100   : > { %v617_v17 = vadd.f32 %v1228_v4, %v590_v9  ;;  %v629_v18 = vadd.f32 %v1228_v4, %v602_v10 }
 0x101   : > { %v615_v21 = vadd.f32 %v1228_v4, %v588_v13  ;;  %v627_v22 = vadd.f32 %v1228_v4, %v600_v14 }
 0x102   : > { %v917_v25 = vpack.c.bf16 %v617_v17, %v616_v15  ;;  %v947_v26 = vpack.c.bf16 %v629_v18, %v628_v16 }
 0x103   : > { %v912_v27 = vpack.c.bf16 %v615_v21, %v614_v19  ;;  %v942_v28 = vpack.c.bf16 %v627_v22, %v626_v20  ;;  %v1008_v29 = vpop.f32.mrb[4].mxu0  ;;  %v1020_v30 = vpop.f32.mrb[4].mxu1 }
 0x104   : > { %959 = vst [vmem:[%s1240_s27 + $0x8] sm:$0xff] %v917_v25   ;;  %965 = vst [vmem:[%s1240_s27 + $0x38] sm:$0xff] %v947_v26   ;;  %v593_v31 = vmul.f32 %v1008_v29, %v520_v51  ;;  %v605_v32 = vmul.f32 %v1020_v30, %v580_v24  ;;  %v404_v33 = vpop.f32.mrb[5].mxu0  ;;  %v452_v34 = vpop.f32.mrb[5].mxu1 }
 0x105   : > { %913 = vst [vmem:[%s1240_s27] sm:$0xff] %v912_v27   ;;  %964 = vst [vmem:[%s1240_s27 + $0x30] sm:$0xff] %v942_v28   ;;  %v591_v35 = vmul.f32 %v510_v49, %v404_v33  ;;  %v603_v36 = vmul.f32 %v570_v61, %v452_v34  ;;  %v1009_v37 = vpop.f32.mrb[6].mxu0  ;;  %v1021_v38 = vpop.f32.mrb[6].mxu1 }
 0x106   : > { %v594_v39 = vmul.f32 %v1009_v37, %v525_v50  ;;  %v606_v40 = vmul.f32 %v1021_v38, %v585_v23  ;;  %v407_v41 = vpop.f32.mrb[7].mxu0  ;;  %v455_v42 = vpop.f32.mrb[7].mxu1  ;;  %v620_v45 = vadd.f32 %v1228_v4, %v593_v31  ;;  %v632_v46 = vadd.f32 %v1228_v4, %v605_v32 }
 0x107   : > { %v592_v43 = vmul.f32 %v1215_v48, %v407_v41  ;;  %v604_v44 = vmul.f32 %v575_v60, %v455_v42  ;;  %v618_v50 = vadd.f32 %v1228_v4, %v591_v35  ;;  %v630_v51 = vadd.f32 %v1228_v4, %v603_v36 }
 0x108   : > { %v621_v47 = vadd.f32 %v1228_v4, %v594_v39  ;;  %v633_v49 = vadd.f32 %v1228_v4, %v606_v40 }
 0x109   : > { %v619_v56 = vadd.f32 %v1228_v4, %v592_v43  ;;  %v631_v48 = vadd.f32 %v1228_v4, %v604_v44 }
 0x10a   : > { %v927_v57 = vpack.c.bf16 %v621_v47, %v620_v45  ;;  %v957_v58 = vpack.c.bf16 %v633_v49, %v632_v46 }
 0x10b   : > { %v922_v59 = vpack.c.bf16 %v619_v56, %v618_v50  ;;  %v952_v60 = vpack.c.bf16 %v631_v48, %v630_v51  ;;  %v1012_v61 = vpop.f32.mrb[8].mxu0 }
 0x10c   : > { %961 = vst [vmem:[%s1240_s27 + $0x18] sm:$0xff] %v927_v57   ;;  %967 = vst [vmem:[%s1240_s27 + $0x48] sm:$0xff] %v957_v58   ;;  %v597_v62 = vmul.f32 %v1012_v61, %v1223_v55  ;;  %v420_v63 = vpop.f32.mrb[9].mxu0 }
 0x10d   : > { %960 = vst [vmem:[%s1240_s27 + $0x10] sm:$0xff] %v922_v59   ;;  %966 = vst [vmem:[%s1240_s27 + $0x40] sm:$0xff] %v952_v60   ;;  %v595_v0 = vmul.f32 %v1219_v53, %v420_v63  ;;  %v1013_v1 = vpop.f32.mrb[10].mxu0 }
 0x10e   : > { %v598_v2 = vmul.f32 %v1013_v1, %v1221_v54  ;;  %v423_v3 = vpop.f32.mrb[11].mxu0  ;;  %v624_v6 = vadd.f32 %v1228_v4, %v597_v62 }
 0x10f   : > { %v596_v5 = vmul.f32 %v1217_v52, %v423_v3  ;;  %v622_v8 = vadd.f32 %v1228_v4, %v595_v0 }
 0x110   : > { %v625_v7 = vadd.f32 %v1228_v4, %v598_v2 }
 0x111   : > { %v623_v55 = vadd.f32 %v1228_v4, %v596_v5 }
 0x112   : > { %v937_v9 = vpack.c.bf16 %v625_v7, %v624_v6 }
 0x113   : > { %v932_v10 = vpack.c.bf16 %v623_v55, %v622_v8 }
 0x114   : > { %963 = vst [vmem:[%s1240_s27 + $0x28] sm:$0xff] %v937_v9  }
 0x115   : > { %962 = vst [vmem:[%s1240_s27 + $0x20] sm:$0xff] %v932_v10  }
 0x116 PF: > { %s14_s17 = sadd.s32 1, %s1095_s17   ;;  %s1285_s15 = smov %s1091_s16 }
 0x117   : > { %p11_p6 = scmp.ge.s32.totalorder %s14_s17, 4   ;;  %s1286_s16 = smov %s1288_s18 }
 0x119   :  { %13 = sbr.rel (!%p11_p6) target bundleno = 2 (0x2), region = 75 }

</bundles_post_ra>
